<compile_context>
chip_gen: v7x
topology: tpu7x:2x2x1
jax: 0.10.0
libtpu: 0.0.40
codegen_flags: <defaults>
</compile_context>

<pallas_src>
import functools
import math

import jax
import jax.numpy as jnp
from jax.experimental import pallas as pl
from jax.experimental.pallas import tpu as pltpu


def make_positional_encoding(d_model: int, max_len: int) -> jnp.ndarray:
    """Identical construction to the PyTorch buffer; shape (max_len, 1, d_model), f32."""
    position = jnp.arange(0, max_len, dtype=jnp.float32)[:, None]            # (max_len, 1)
    div_term = jnp.exp(
        jnp.arange(0, d_model, 2, dtype=jnp.float32) * (-math.log(10000.0) / d_model)
    )                                                                         # (d_model//2,)
    angles = position * div_term                                              # (max_len, d_model//2)
    pe = jnp.zeros((max_len, d_model), dtype=jnp.float32)
    pe = pe.at[:, 0::2].set(jnp.sin(angles))
    pe = pe.at[:, 1::2].set(jnp.cos(angles))
    return pe[:, None, :]                                                     # (max_len, 1, d_model)


def _choose_tile_s(S: int, row_bytes: int, target_bytes: int = 4 << 20) -> int:
    """Rows of x per block.  Aim for ~target_bytes of x per tile, multiple-of-8
    rows, and >=2 grid steps when possible (software pipelining + v7x dual-TC
    sharding).  Never falls back to a single oversized block: if S has no
    convenient divisor, return a non-dividing tile and let Pallas mask the
    tail block (grid uses pl.cdiv)."""
    max_rows = max(8, (target_bytes // max(row_bytes, 1)) // 8 * 8)
    if S <= max_rows:
        if S >= 16 and S % 8 == 0:
            half = S // 2
            # Prefer a multiple-of-8 divisor near S/2 so blocks divide evenly.
            for t in range(half - half % 8, 7, -8):
                if S % t == 0:
                    return t
            return (half + 7) // 8 * 8
        return S                                    # tiny sequence: one block
    # Largest multiple-of-8 divisor of S that fits the byte target.
    for t in range(max_rows, 7, -8):
        if S % t == 0:
            return t
    return max_rows                                 # tail block padded/masked by Pallas


def _add_pe_kernel(x_ref, pe_ref, o_ref):
    # pe block is (tile_s, 1, D) f32; broadcast over the batch axis in-register.
    o_ref[...] = (x_ref[...].astype(jnp.float32) + pe_ref[...]).astype(o_ref.dtype)


def _add_pe_dropout_prng_kernel(seed_ref, x_ref, pe_ref, o_ref, *, drop_threshold, inv_keep):
    # Distinct PRNG stream per (seed, tile): seeding with both values avoids the
    # seed+tile aliasing of `seed + program_id`.
    pltpu.prng_seed(seed_ref[0], pl.program_id(0))
    y = x_ref[...].astype(jnp.float32) + pe_ref[...]
    bits = pltpu.prng_random_bits(y.shape)
    if bits.dtype != jnp.uint32:
        bits = pltpu.bitcast(bits, jnp.uint32)
    keep = bits >= jnp.uint32(drop_threshold)       # P(drop) = drop_threshold / 2^32 = p
    o_ref[...] = jnp.where(keep, y * inv_keep, 0.0).astype(o_ref.dtype)


def _add_pe_dropout_bits_kernel(x_ref, pe_ref, bits_ref, o_ref, *, drop_threshold, inv_keep):
    # Portable path (no TPU-only PRNG primitives): random bits streamed in.
    y = x_ref[...].astype(jnp.float32) + pe_ref[...]
    keep = bits_ref[...] >= jnp.uint32(drop_threshold)
    o_ref[...] = jnp.where(keep, y * inv_keep, 0.0).astype(o_ref.dtype)


def positional_encoding_forward(
    x: jnp.ndarray,
    pe: jnp.ndarray,
    *,
    dropout_p: float = 0.1,
    training: bool = False,
    seed: int = 0,
    tile_s: int | None = None,
    use_on_chip_prng: bool | None = None,
):
    """x: (S, B, D); pe: (max_len, 1, D) float32 buffer. Returns (S, B, D) in x.dtype."""
    S, B, D = x.shape
    assert pe.ndim == 3 and pe.shape[1] == 1, "pe must have shape (max_len, 1, d_model)"
    assert pe.shape[2] == D, "pe d_model does not match x"
    assert pe.shape[0] >= S, "sequence length exceeds positional-encoding buffer"

    pe_f32 = pe.astype(jnp.float32)                 # buffer is already f32; no-op normally

    row_bytes = B * D * x.dtype.itemsize
    if tile_s is None:
        tile_s = _choose_tile_s(S, row_bytes)
    grid = (pl.cdiv(S, tile_s),)

    # index_maps receive (*grid_idx, *prefetch_refs); *_ absorbs the optional seed ref.
    x_spec = pl.BlockSpec((tile_s, B, D), lambda i, *_: (i, 0, 0))
    pe_spec = pl.BlockSpec((tile_s, 1, D), lambda i, *_: (i, 0, 0))
    out_spec = pl.BlockSpec((tile_s, B, D), lambda i, *_: (i, 0, 0))

    compiler_params = pltpu.CompilerParams(
        dimension_semantics=("parallel",),
        vmem_limit_bytes=32 * 1024 * 1024,
    )
    out_shape = jax.ShapeDtypeStruct((S, B, D), x.dtype)

    if not (training and dropout_p > 0.0):
        return pl.pallas_call(
            _add_pe_kernel,
            out_shape=out_shape,
            grid_spec=pltpu.PrefetchScalarGridSpec(
                num_scalar_prefetch=0, grid=grid,
                in_specs=[x_spec, pe_spec], out_specs=out_spec),
            compiler_params=compiler_params,
        )(x, pe_f32)

    drop_threshold = min(int(round(dropout_p * 4294967296.0)), 4294967295)
    inv_keep = float(1.0 / (1.0 - dropout_p))

    if use_on_chip_prng is None:
        use_on_chip_prng = jax.default_backend() == "tpu"

    if use_on_chip_prng:
        kernel = functools.partial(
            _add_pe_dropout_prng_kernel,
            drop_threshold=drop_threshold, inv_keep=inv_keep)
        seed_arr = jnp.asarray([seed], dtype=jnp.int32)
        return pl.pallas_call(
            kernel,
            out_shape=out_shape,
            grid_spec=pltpu.PrefetchScalarGridSpec(
                num_scalar_prefetch=1, grid=grid,
                in_specs=[x_spec, pe_spec], out_specs=out_spec),
            compiler_params=compiler_params,
        )(seed_arr, x, pe_f32)

    # Fallback for non-TPU backends (e.g. CPU interpret): stream pre-generated bits.
    bits = jax.random.bits(jax.random.PRNGKey(seed), (S, B, D), dtype=jnp.uint32)
    bits_spec = pl.BlockSpec((tile_s, B, D), lambda i, *_: (i, 0, 0))
    kernel = functools.partial(
        _add_pe_dropout_bits_kernel,
        drop_threshold=drop_threshold, inv_keep=inv_keep)
    return pl.pallas_call(
        kernel,
        out_shape=out_shape,
        grid_spec=pltpu.PrefetchScalarGridSpec(
            num_scalar_prefetch=0, grid=grid,
            in_specs=[x_spec, pe_spec, bits_spec], out_specs=out_spec),
        compiler_params=compiler_params,
    )(x, pe_f32, bits)


if __name__ == "__main__":
    key = jax.random.PRNGKey(0)
    k1, k2 = jax.random.split(key)

    # --- eval-mode forward, f32, small shapes: seq=16, batch=2, d_model=32 ---
    S, B, D = 16, 2, 32
    MAX_LEN = 64
    x = jax.random.normal(k1, (S, B, D), dtype=jnp.float32)
    pe = make_positional_encoding(D, MAX_LEN)                                 # (MAX_LEN, 1, D)
    out = jax.block_until_ready(positional_encoding_forward(x, pe))
    ref = x + pe[:S]
    assert out.shape == (S, B, D)
    assert jnp.allclose(out, ref, atol=1e-6, rtol=1e-6)

    # --- bf16 path on lane-dense shapes: seq=64, batch=4, d_model=128 ---
    S2, B2, D2 = 64, 4, 128
    MAX_LEN2 = 128
    x2_f32 = jax.random.normal(k2, (S2, B2, D2), dtype=jnp.float32)
    x2 = x2_f32.astype(jnp.bfloat16)
    pe2 = make_positional_encoding(D2, MAX_LEN2)
    out2 = jax.block_until_ready(positional_encoding_forward(x2, pe2))
    ref2 = (x2.astype(jnp.float32) + pe2[:S2]).astype(jnp.bfloat16)
    assert out2.dtype == jnp.bfloat16
    assert jnp.allclose(out2.astype(jnp.float32), ref2.astype(jnp.float32), atol=1e-2, rtol=1e-2)

    # --- fused training-mode dropout (p=0.1), checked statistically ---
    p = 0.1
    out_d = jax.block_until_ready(
        positional_encoding_forward(x2_f32, pe2, dropout_p=p, training=True, seed=1234)
    )
    ref_d = x2_f32 + pe2[:S2]
    dropped = out_d == 0.0
    drop_frac = float(jnp.mean(dropped.astype(jnp.float32)))
    assert 0.02 <= drop_frac <= 0.25, f"unexpected dropout fraction {drop_frac}"
    expected = jnp.where(dropped, 0.0, ref_d / (1.0 - p))
    assert jnp.allclose(out_d, expected, atol=1e-5, rtol=1e-5)

    print("KERNEL_OK")
</pallas_src>

<mosaic_0001>
module attributes {stable_mosaic.version = 11 : i64} {
  func.func @_add_pe_kernel(%arg0: i32, %arg1: memref<8x2x32xf32, #tpu.memory_space<vmem>>, %arg2: memref<8x1x32xf32, #tpu.memory_space<vmem>>, %arg3: memref<8x2x32xf32, #tpu.memory_space<vmem>>) attributes {dimension_semantics = [#tpu.dimension_semantics<parallel>], iteration_bounds = array<i64: 2>, scalar_prefetch = 0 : i64, scratch_operands = 0 : i64, tpu.core_type = #tpu.core_type<tc>, window_params = [{transform_indices = @transform_0, window_bounds = array<i64: 8, 2, 32>}, {transform_indices = @transform_1, window_bounds = array<i64: 8, 1, 32>}, {transform_indices = @transform_2, window_bounds = array<i64: 8, 2, 32>}]} {
    %c0 = arith.constant 0 : index
    %c0_0 = arith.constant 0 : index
    %c0_1 = arith.constant 0 : index
    %0 = vector.load %arg1[%c0, %c0_0, %c0_1] : memref<8x2x32xf32, #tpu.memory_space<vmem>>, vector<8x2x32xf32>
    %c0_2 = arith.constant 0 : index
    %c0_3 = arith.constant 0 : index
    %c0_4 = arith.constant 0 : index
    %1 = vector.load %arg2[%c0_2, %c0_3, %c0_4] : memref<8x1x32xf32, #tpu.memory_space<vmem>>, vector<8x1x32xf32>
    %2 = vector.broadcast %1 : vector<8x1x32xf32> to vector<8x2x32xf32>
    %3 = arith.addf %0, %2 : vector<8x2x32xf32>
    %c0_5 = arith.constant 0 : index
    %c0_6 = arith.constant 0 : index
    %c0_7 = arith.constant 0 : index
    %4 = vector.load %arg3[%c0_5, %c0_6, %c0_7] : memref<8x2x32xf32, #tpu.memory_space<vmem>>, vector<8x2x32xf32>
    tpu.vector_store %arg3[%c0_5, %c0_6, %c0_7], %3 {strides = array<i32>} : memref<8x2x32xf32, #tpu.memory_space<vmem>>, vector<8x2x32xf32>,
    return
  }
  func.func @transform_0(%arg0: i32) -> (i32, i32, i32) {
    %c0_i32 = arith.constant 0 : i32
    %c0_i32_0 = arith.constant 0 : i32
    %c0_i32_1 = arith.constant 0 : i32
    return %arg0, %c0_i32, %c0_i32_0 : i32, i32, i32
  }
  func.func @transform_1(%arg0: i32) -> (i32, i32, i32) {
    %c0_i32 = arith.constant 0 : i32
    %c0_i32_0 = arith.constant 0 : i32
    %c0_i32_1 = arith.constant 0 : i32
    return %arg0, %c0_i32, %c0_i32_0 : i32, i32, i32
  }
  func.func @transform_2(%arg0: i32) -> (i32, i32, i32) {
    %c0_i32 = arith.constant 0 : i32
    %c0_i32_0 = arith.constant 0 : i32
    %c0_i32_1 = arith.constant 0 : i32
    return %arg0, %c0_i32, %c0_i32_0 : i32, i32, i32
  }
}

</mosaic_0001>

<bundles_post_ra>
// kernel: tpu_custom_call.1
= control target key start
LH: loop header
LB: loop body
LE: loop exit
PB: predicated region body
PF: predicated region fallthrough
CT: control target
= control target key end

     0   :  { %7 = vsyncpa [#allocation3], 0  ;;  %s623_s0 = inlined_call_operand.vmem [shape: f32[16,2,32], index: 0, kind: input, shape index: {}]   ;;  %s624_s1 = inlined_call_operand.vmem [shape: f32[64,1,32], index: 1, kind: input, shape index: {}]   ;;  %s625_s2 = inlined_call_operand.hbm [shape: f32[16,2,32], index: 2, kind: output, shape index: {}]  }
   0x1   :  { %9 = vsyncpa [#allocation3 + $0x1], 0  ;;  %s475_s9 = smov 0   ;;  %s477_s10 = smov 0  }
   0x2   :  { %s479_s11 = smov 0   ;;  %s481_s12 = smov 0  }
   0x3 LB: > { %s496_s13 = sadd.s32 4294967295, %s455_s12   ;;  %s330_s14 = sadd.s32 4294967294, %s455_s12   ;;  %s455_s12 = sphi %s481_s12, %s631_s12   ;;  %s451_s11 = sphi %s479_s11, %s630_s11   ;;  %s447_s10 = sphi %s477_s10, %s629_s10   ;;  %s443_s9 = sphi %s475_s9, %s628_s9  }
   0x4   : > { %s500_s15 = sadd.s32 1, %s455_s12   ;;  %s74_s16 = sadd.s32 1, %s451_s11 }
   0x5   : > { %s71_s17 = ssub.s32 %s455_s12, %s500_s15  ;;  %p84_p0 = scmp.ne.s32.totalorder %s451_s11, %s447_s10 }
   0x6   : > { %p72_p1 = scmp.eq.s32.totalorder %s71_s17, 0  ;;  %p85_p2 = scmp.eq.s32.totalorder %s496_s13, 1 }
   0x7   : > { %p90_p3 = scmp.ne.s32.totalorder %s447_s10, %s443_s9  ;;  %p91_p4 = scmp.eq.s32.totalorder %s330_s14, 1 }
   0x8   : > { %s511_s18 = scalar_select %p72_p1, %s451_s11, %s74_s16  }
   0x9   : > { %p513_p5 = por %p85_p2, %p84_p0  ;;  %p517_p6 = por %p91_p4, %p90_p3 }
   0xa   : > { %p333_p7 = scmp.ge.s32.totalorder %s455_s12, 1  ;;  %p126_p8 = scmp.lt.s32.totalorder %s455_s12, 3 }
   0xc   : > { %p127_p9 = pnand %p333_p7, %p126_p8 }
   0xd   : > { %s149_s21 = sand.u32 (!%p127_p9), 1, %s447_s10   ;;  %s335_s22 = sshll.u32 (!%p127_p9), %s496_s13, 3  ;;  %vm236_vm0 = vcmask (!%p127_p9), 254976  }
   0xe   : > { %130 = sbr.rel (%p127_p9) target bundleno = 53 (0x35), region = 28  ;;  %s334_s23 = sshll.u32 (!%p127_p9), %s149_s21, 4 }
   0xf   : > { %p153_p10 = scmp.lt.s32.totalorder (!%p127_p9), %s335_s22, 15  ;;  %p159_p11 = scmp.lt.s32.totalorder (!%p127_p9), %s335_s22, 63 }
  0x10   : > { %s539_s4 = scalar_lea.vmem (!%p127_p9), [#allocation2], %s334_s23  ;;  %s351_s6 = sshll.u32 (!%p127_p9), %s496_s13, 8 }
  0x11   : > { %s259_s5 = sshll.u32 (!%p127_p9), %s539_s4, 4  ;;  %s570_s13 = scalar_lea.hbm (!%p127_p9), %s625_s2, %s351_s6  ;;  %s559_s5 = int_to_ptr.vmem [resolvable:$true] %s259_s5 }
  0x12   : > { %s582_s14 = scalar_lea.sflag (!%p127_p9), [#allocation3], %s149_s21  ;;  %s393_s16 = scalar_lea.vmem (!%p127_p9), %s559_s5, 256 }
  0x13   : > { %p394_p12 = scmp.ne.s32.totalorder (!%p127_p9), %s559_s5, %s393_s16  ;;  %s457_s17 = smov (!%p127_p9), [#allocation2]  }
  0x15   : > { %s154_s24 = scalar_select %p153_p10, %s335_s22, 15 }
  0x16   : > { %s633_s22 = smov (!%p159_p11, %s335_s22), 63  ;;  %p395_p13 = pnand %p394_p12, %p513_p5 }
  0x17   : > { %s336_s25 = sshll.u32 %s154_s24, 1  ;;  %s535_s3 = scalar_lea.vmem %s624_s1, %s633_s22 }
  0x18   : > { %s530_s28 = scalar_lea.vmem %s623_s0, %s336_s25  ;;  %v338_v1 = vld [vmem:[%s535_s3] ss:$0 sm:$0xff]  ;;  %v339_v4 = vld [vmem:[%s535_s3 + $0x1] ss:$0 sm:$0xff]  ;;  %v340_v7 = vld [vmem:[%s535_s3 + $0x2] ss:$0 sm:$0xff]  ;;  %p396_p0 = pneg %p395_p13 }
  0x19   : > { %v164_v0 = vld [vmem:[%s530_s28] sm:$0x3]  ;;  %v165_v3 = vld [vmem:[%s530_s28 + $0x2] sm:$0x3]  ;;  %v166_v5 = vld [vmem:[%s530_s28 + $0x4] sm:$0x3] }
  0x1a   : > { %v228_v2 = vadd.f32 %v338_v1, %v164_v0  ;;  %v229_v6 = vadd.f32 %v339_v4, %v165_v3  ;;  %v167_v8 = vld [vmem:[%s530_s28 + $0x6] sm:$0x3]  ;;  %v341_v9 = vld [vmem:[%s535_s3 + $0x3] ss:$0 sm:$0xff]  ;;  %v230_v10 = vadd.f32 %v340_v7, %v166_v5  ;;  %v168_v12 = vld [vmem:[%s530_s28 + $0x8] sm:$0x3] }
  0x1b   : > { %v231_v11 = vadd.f32 %v341_v9, %v167_v8  ;;  %v342_v13 = vld [vmem:[%s535_s3 + $0x4] ss:$0 sm:$0xff]  ;;  %v169_v14 = vld [vmem:[%s530_s28 + $0xa] sm:$0x3]  ;;  %v343_v16 = vld [vmem:[%s535_s3 + $0x5] ss:$0 sm:$0xff] }
  0x1c   : > { %237 = vst.msk [vmem:[%s539_s4] sm:$0x3] %vm236_vm0, %v228_v2  ;;  %238 = vst.msk [vmem:[%s539_s4 + $0x2] sm:$0x3] %vm236_vm0, %v229_v6  ;;  %v232_v15 = vadd.f32 %v342_v13, %v168_v12  ;;  %v170_v17 = vld [vmem:[%s530_s28 + $0xc] sm:$0x3]  ;;  %v233_v19 = vadd.f32 %v343_v16, %v169_v14 }
  0x1d   : > { %v344_v18 = vld [vmem:[%s535_s3 + $0x6] ss:$0 sm:$0xff]  ;;  %239 = vst.msk [vmem:[%s539_s4 + $0x4] sm:$0x3] %vm236_vm0, %v230_v10  ;;  %240 = vst.msk [vmem:[%s539_s4 + $0x6] sm:$0x3] %vm236_vm0, %v231_v11 }
  0x1e   : > { %v234_v20 = vadd.f32 %v344_v18, %v170_v17  ;;  %v171_v21 = vld [vmem:[%s530_s28 + $0xe] sm:$0x3]  ;;  %v345_v22 = vld [vmem:[%s535_s3 + $0x7] ss:$0 sm:$0xff]  ;;  %241 = vst.msk [vmem:[%s539_s4 + $0x8] sm:$0x3] %vm236_vm0, %v232_v15 }
  0x1f   : > { %v235_v23 = vadd.f32 %v345_v22, %v171_v21  ;;  %242 = vst.msk [vmem:[%s539_s4 + $0xa] sm:$0x3] %vm236_vm0, %v233_v19  ;;  %s397_s22 = sshll.u32 %s457_s17, 4  ;;  %s398_s22 = int_to_ptr.vmem [resolvable:$false] %s397_s22 }
  0x20   : > { %243 = vst.msk [vmem:[%s539_s4 + $0xc] sm:$0x3] %vm236_vm0, %v234_v20  ;;  %s399_s23 = scalar_lea.vmem %s398_s22, 512  ;;  %p400_p1 = scmp.lt.s32.totalorder %s559_s5, %s398_s22 }
  0x21   : > { %244 = vst.msk [vmem:[%s539_s4 + $0xe] sm:$0x3] %vm236_vm0, %v235_v23  ;;  %p401_p2 = scmp.lt.s32.totalorder %s399_s23, %s393_s16 }
  0x23   : > { %p402_p3 = por %p401_p2, %p400_p1 }
  0x25   : > { %p403_p4 = pnand %p402_p3, %p396_p0 }
  0x27   : > { %406 = shalt.err (!%p403_p4)
}
  0x28   : > { %s407_s21 = scalar_lea.hbm %s570_s13, 256  ;;  %s411_s26 = scalar_lea.hbm %s625_s2, 512 }
  0x29   : > { %p408_p7 = scmp.ne.s32.totalorder %s570_s13, %s407_s21  ;;  %p412_p10 = scmp.lt.u32.totalorder %s570_s13, %s625_s2 }
  0x2a   : > { %p413_p11 = scmp.lt.u32.totalorder %s411_s26, %s407_s21  ;;  %p415_p13 = scmp.lt.u32.totalorder %s407_s21, %s570_s13 }
  0x2b   : > { %p409_p8 = pnand %p408_p7, %p513_p5 }
  0x2c   : > { %p414_p12 = por %p413_p11, %p412_p10 }
  0x2d   : > { %p410_p9 = pneg %p409_p8 }
  0x2e   : > { %p416_p0 = por %p415_p13, %p414_p12 }
  0x30   : > { %p417_p1 = pnand %p416_p0, %p410_p9 }
  0x32   : > { %420 = shalt.err (!%p417_p1)
}
  0x33   : > { %s458_s29 = smov 32   ;;  %s459_s30 = smov 2  }
  0x34   : > { %352 = dma.vmem_to_hbm [thread:$0]  (%p513_p5), %s559_s5, 256, %s570_s13, %s582_s14, %s458_s29, %s458_s29, %s459_s30  }
  0x35 PF: > { %p358_p2 = scmp.ge.s32.totalorder %s455_s12, 2  ;;  %s274_s3 = sand.u32 1, %s443_s9  }
  0x36   : > { %s275_s4 = scalar_lea.sflag [#allocation3], %s274_s3 }
  0x37   : > { %p355_p3 = pnand %p358_p2, %p517_p6 }
  0x39   : > { %438 = dma.done.wait (!%p355_p3), %s275_s4, 256  }
  0x3a   : > { %440 = vsyncadd (!%p355_p3), %s275_s4, 4294967040  ;;  %p12_p4 = scmp.ge.s32.totalorder %s500_s15, 4   ;;  %s628_s9 = smov %s447_s10 }
  0x3b   : > { %s629_s10 = smov %s451_s11  ;;  %s630_s11 = smov %s511_s18 }
  0x3c   : > { %s631_s12 = smov %s500_s15  ;;  %14 = sbr.rel (!%p12_p4) target bundleno = 3 (0x3), region = 66 }
  0x43   :  { %280 = vsyncpa [#allocation3], 1 }
  0x44   :  { %282 = vsyncpa [#allocation3 + $0x1], 1 }

</bundles_post_ra>
